<compile_context>
chip_gen: v7x
topology: tpu7x:2x2x1
jax: 0.10.0
libtpu: 0.0.40
codegen_flags: <defaults>
</compile_context>

<pallas_src>
import jax
import jax.numpy as jnp
from jax import lax
from jax.experimental import pallas as pl
from jax.experimental.pallas import tpu as pltpu


# ----------------------------- model dimensions ------------------------------
VOCAB_MUSIC, VOCAB_COMPOSER, VOCAB_AUDIENCE = 100, 50, 30
EMBED_DIM = 32
NUM_CLASSES = 16

VPAD = 128    # pad vocab (contraction dim of the gather-matmul) to 128-lane width
CPAD = 128    # pad classes 16 -> 128 so the output store is lane-dense


# ------------------------------- Pallas kernel -------------------------------
def _fused_forward_kernel(idm_ref, idc_ref, ida_ref,
                          tm_ref, tc_ref, ta_ref,
                          b_ref, o_ref):
    """ids -> one-hot mean counts -> (counts @ folded_table) -> +bias -> sigmoid.

    idm/idc/ida: (B, L)        int32 token ids
    tm/tc/ta:    (VPAD, CPAD)  f32 folded tables  (emb_pad @ W_slice)
    b:           (1, CPAD)     f32 zero-padded bias
    o:           (B, CPAD)     f32 probabilities (cols >= C are 0.5, sliced off)
    """
    B, L = idm_ref.shape
    inv_L = 1.0 / L

    def pooled_logits(ids_ref, tbl_ref):
        ids = ids_ref[...]                                           # (B, L) i32
        iota_v = lax.broadcasted_iota(jnp.int32, (B, L, VPAD), 2)    # (B, L, VPAD)
        onehot = (ids[:, :, None] == iota_v).astype(jnp.float32)     # (B, L, VPAD)
        counts = jnp.sum(onehot, axis=1) * inv_L                     # (B, VPAD)
        # mean_l emb[ids[:,l]] @ W_slice == counts @ (emb @ W_slice) -> one MXU pass
        return jnp.dot(counts, tbl_ref[...], preferred_element_type=jnp.float32)

    logits = (pooled_logits(idm_ref, tm_ref)
              + pooled_logits(idc_ref, tc_ref)
              + pooled_logits(ida_ref, ta_ref)
              + b_ref[...])

    # Sigmoid: exp routes to the EUP; reciprocal kept exact for 1e-5 parity.
    o_ref[...] = pl.reciprocal(1.0 + jnp.exp(-logits), approx=False)


def fused_forward(ids_music, ids_composer, ids_audience,
                  tbl_music, tbl_composer, tbl_audience,
                  b_pad, num_classes):
    """Single-invocation (grid-less) fused forward pass. Returns (B, num_classes) f32."""
    B = ids_music.shape[0]
    vmem = lambda: pl.BlockSpec(memory_space=pltpu.MemorySpace.VMEM)
    probs_pad = pl.pallas_call(
        _fused_forward_kernel,
        out_shape=jax.ShapeDtypeStruct((B, CPAD), jnp.float32),
        in_specs=[vmem() for _ in range(7)],
        out_specs=vmem(),
    )(ids_music, ids_composer, ids_audience,
      tbl_music, tbl_composer, tbl_audience, b_pad)
    return probs_pad[:, :num_classes]


# ------------------------------- model wrapper --------------------------------
class NeuralNetworkJAX:
    """Deterministic parameterization of the concretized forward pass."""

    def __init__(self,
                 vocab_music=VOCAB_MUSIC, vocab_composer=VOCAB_COMPOSER,
                 vocab_audience=VOCAB_AUDIENCE, embed_dim=EMBED_DIM,
                 num_classes=NUM_CLASSES, seed=0):
        k = jax.random.PRNGKey(seed)
        k_em, k_ec, k_ea, k_w, _ = jax.random.split(k, 5)
        self.num_classes = num_classes

        self.emb_music = jax.random.normal(k_em, (vocab_music, embed_dim),
                                           jnp.float32) * 0.02
        self.emb_composer = jax.random.normal(k_ec, (vocab_composer, embed_dim),
                                              jnp.float32) * 0.02
        self.emb_audience = jax.random.normal(k_ea, (vocab_audience, embed_dim),
                                              jnp.float32) * 0.02
        feat_dim = 3 * embed_dim
        self.w = jax.random.normal(k_w, (feat_dim, num_classes),
                                   jnp.float32) * 0.05
        self.b = jnp.zeros((1, num_classes), jnp.float32)

        # ---- kernel-layout params, built ONCE at init (never per forward) ----
        emb_music_pad = jnp.zeros((VPAD, embed_dim), jnp.float32) \
            .at[:vocab_music].set(self.emb_music)
        emb_composer_pad = jnp.zeros((VPAD, embed_dim), jnp.float32) \
            .at[:vocab_composer].set(self.emb_composer)
        emb_audience_pad = jnp.zeros((VPAD, embed_dim), jnp.float32) \
            .at[:vocab_audience].set(self.emb_audience)
        w_pad = jnp.zeros((feat_dim, CPAD), jnp.float32) \
            .at[:, :num_classes].set(self.w)

        # Fold the classifier weight into each (padded) embedding table:
        #   (counts @ emb) @ W_slice == counts @ (emb @ W_slice)
        E = embed_dim
        self.tbl_music = emb_music_pad @ w_pad[0:E, :]          # (VPAD, CPAD)
        self.tbl_composer = emb_composer_pad @ w_pad[E:2 * E, :]
        self.tbl_audience = emb_audience_pad @ w_pad[2 * E:3 * E, :]
        self.b_pad = jnp.zeros((1, CPAD), jnp.float32) \
            .at[:, :num_classes].set(self.b)

    def forward(self, x_music, x_composer, x_audience):
        # Entire forward (gather + mean-pool + dense + sigmoid) in one Pallas call.
        return fused_forward(x_music, x_composer, x_audience,
                             self.tbl_music, self.tbl_composer, self.tbl_audience,
                             self.b_pad, self.num_classes)


# ------------------------------------ main -------------------------------------
if __name__ == "__main__":
    B, L = 16, 8  # batch, sequence length of each id input
    model = NeuralNetworkJAX()

    key = jax.random.PRNGKey(0)
    km, kc, ka = jax.random.split(key, 3)
    x_music = jax.random.randint(km, (B, L), 0, VOCAB_MUSIC, dtype=jnp.int32)
    x_composer = jax.random.randint(kc, (B, L), 0, VOCAB_COMPOSER, dtype=jnp.int32)
    x_audience = jax.random.randint(ka, (B, L), 0, VOCAB_AUDIENCE, dtype=jnp.int32)

    probs = jax.block_until_ready(model.forward(x_music, x_composer, x_audience))

    # Reference check against plain JAX (unpadded, unfolded params).
    fm = jnp.take(model.emb_music, x_music, axis=0).mean(axis=1)
    fc = jnp.take(model.emb_composer, x_composer, axis=0).mean(axis=1)
    fa = jnp.take(model.emb_audience, x_audience, axis=0).mean(axis=1)
    ref = jax.nn.sigmoid(jnp.concatenate([fm, fc, fa], -1) @ model.w + model.b)
    assert probs.shape == (B, NUM_CLASSES)
    assert jnp.allclose(probs, ref, atol=1e-5), "mismatch vs reference"

    # predict()-style post-processing (glue, matches `logit > 0.5` / `max(logit, dim=1)`).
    y_pred = probs > 0.5
    y_pred_top = jnp.argmax(probs, axis=1)
    jax.block_until_ready((y_pred, y_pred_top))

    print("KERNEL_OK")
</pallas_src>

<mosaic_0001>
module attributes {stable_mosaic.version = 11 : i64} {
  func.func @_fused_forward_kernel(%arg0: memref<16x8xi32, #tpu.memory_space<vmem>>, %arg1: memref<16x8xi32, #tpu.memory_space<vmem>>, %arg2: memref<16x8xi32, #tpu.memory_space<vmem>>, %arg3: memref<128x128xf32, #tpu.memory_space<vmem>>, %arg4: memref<128x128xf32, #tpu.memory_space<vmem>>, %arg5: memref<128x128xf32, #tpu.memory_space<vmem>>, %arg6: memref<1x128xf32, #tpu.memory_space<vmem>>, %arg7: memref<16x128xf32, #tpu.memory_space<vmem>>) attributes {dimension_semantics = [], scalar_prefetch = 0 : i64, scratch_operands = 0 : i64, tpu.core_type = #tpu.core_type<tc>} {
    %c0 = arith.constant 0 : index
    %c0_0 = arith.constant 0 : index
    %0 = vector.load %arg0[%c0, %c0_0] : memref<16x8xi32, #tpu.memory_space<vmem>>, vector<16x8xi32>
    %1 = tpu.iota {dimensions = array<i32: 2>} : vector<16x8x128xi32>
    %2 = vector.shape_cast %0 : vector<16x8xi32> to vector<16x8x1xi32>
    %3 = vector.broadcast %2 : vector<16x8x1xi32> to vector<16x8x128xi32>
    %4 = arith.cmpi eq, %3, %1 : vector<16x8x128xi32>
    %5 = arith.extui %4 : vector<16x8x128xi1> to vector<16x8x128xi32>
    %6 = arith.sitofp %5 : vector<16x8x128xi32> to vector<16x8x128xf32>
    %cst = arith.constant dense<0.000000e+00> : vector<16x128xf32>
    %7 = vector.multi_reduction <add>, %6, %cst [1] : vector<16x8x128xf32> to vector<16x128xf32>
    %cst_1 = arith.constant 1.250000e-01 : f32
    %8 = vector.broadcast %cst_1 : f32 to vector<16x128xf32>
    %9 = arith.mulf %7, %8 : vector<16x128xf32>
    %c0_2 = arith.constant 0 : index
    %c0_3 = arith.constant 0 : index
    %10 = vector.load %arg3[%c0_2, %c0_3] : memref<128x128xf32, #tpu.memory_space<vmem>>, vector<128x128xf32>
    %cst_4 = arith.constant dense<0.000000e+00> : vector<16x128xf32>
    %11 = tpu.matmul %9, %10, %cst_4 {dimension_numbers = #tpu.dot_dimension_numbers<[1], [0], [0], [1], [0, 0, 1, 1], [], []>} : vector<16x128xf32>, vector<128x128xf32>, vector<16x128xf32> -> vector<16x128xf32>
    %c0_5 = arith.constant 0 : index
    %c0_6 = arith.constant 0 : index
    %12 = vector.load %arg1[%c0_5, %c0_6] : memref<16x8xi32, #tpu.memory_space<vmem>>, vector<16x8xi32>
    %13 = tpu.iota {dimensions = array<i32: 2>} : vector<16x8x128xi32>
    %14 = vector.shape_cast %12 : vector<16x8xi32> to vector<16x8x1xi32>
    %15 = vector.broadcast %14 : vector<16x8x1xi32> to vector<16x8x128xi32>
    %16 = arith.cmpi eq, %15, %13 : vector<16x8x128xi32>
    %17 = arith.extui %16 : vector<16x8x128xi1> to vector<16x8x128xi32>
    %18 = arith.sitofp %17 : vector<16x8x128xi32> to vector<16x8x128xf32>
    %cst_7 = arith.constant dense<0.000000e+00> : vector<16x128xf32>
    %19 = vector.multi_reduction <add>, %18, %cst_7 [1] : vector<16x8x128xf32> to vector<16x128xf32>
    %cst_8 = arith.constant 1.250000e-01 : f32
    %20 = vector.broadcast %cst_8 : f32 to vector<16x128xf32>
    %21 = arith.mulf %19, %20 : vector<16x128xf32>
    %c0_9 = arith.constant 0 : index
    %c0_10 = arith.constant 0 : index
    %22 = vector.load %arg4[%c0_9, %c0_10] : memref<128x128xf32, #tpu.memory_space<vmem>>, vector<128x128xf32>
    %cst_11 = arith.constant dense<0.000000e+00> : vector<16x128xf32>
    %23 = tpu.matmul %21, %22, %cst_11 {dimension_numbers = #tpu.dot_dimension_numbers<[1], [0], [0], [1], [0, 0, 1, 1], [], []>} : vector<16x128xf32>, vector<128x128xf32>, vector<16x128xf32> -> vector<16x128xf32>
    %24 = arith.addf %11, %23 : vector<16x128xf32>
    %c0_12 = arith.constant 0 : index
    %c0_13 = arith.constant 0 : index
    %25 = vector.load %arg2[%c0_12, %c0_13] : memref<16x8xi32, #tpu.memory_space<vmem>>, vector<16x8xi32>
    %26 = tpu.iota {dimensions = array<i32: 2>} : vector<16x8x128xi32>
    %27 = vector.shape_cast %25 : vector<16x8xi32> to vector<16x8x1xi32>
    %28 = vector.broadcast %27 : vector<16x8x1xi32> to vector<16x8x128xi32>
    %29 = arith.cmpi eq, %28, %26 : vector<16x8x128xi32>
    %30 = arith.extui %29 : vector<16x8x128xi1> to vector<16x8x128xi32>
    %31 = arith.sitofp %30 : vector<16x8x128xi32> to vector<16x8x128xf32>
    %cst_14 = arith.constant dense<0.000000e+00> : vector<16x128xf32>
    %32 = vector.multi_reduction <add>, %31, %cst_14 [1] : vector<16x8x128xf32> to vector<16x128xf32>
    %cst_15 = arith.constant 1.250000e-01 : f32
    %33 = vector.broadcast %cst_15 : f32 to vector<16x128xf32>
    %34 = arith.mulf %32, %33 : vector<16x128xf32>
    %c0_16 = arith.constant 0 : index
    %c0_17 = arith.constant 0 : index
    %35 = vector.load %arg5[%c0_16, %c0_17] : memref<128x128xf32, #tpu.memory_space<vmem>>, vector<128x128xf32>
    %cst_18 = arith.constant dense<0.000000e+00> : vector<16x128xf32>
    %36 = tpu.matmul %34, %35, %cst_18 {dimension_numbers = #tpu.dot_dimension_numbers<[1], [0], [0], [1], [0, 0, 1, 1], [], []>} : vector<16x128xf32>, vector<128x128xf32>, vector<16x128xf32> -> vector<16x128xf32>
    %37 = arith.addf %24, %36 : vector<16x128xf32>
    %c0_19 = arith.constant 0 : index
    %c0_20 = arith.constant 0 : index
    %38 = vector.load %arg6[%c0_19, %c0_20] : memref<1x128xf32, #tpu.memory_space<vmem>>, vector<1x128xf32>
    %39 = vector.broadcast %38 : vector<1x128xf32> to vector<16x128xf32>
    %40 = arith.addf %37, %39 : vector<16x128xf32>
    %cst_21 = arith.constant 0.000000e+00 : f32
    %41 = vector.broadcast %cst_21 : f32 to vector<16x128xf32>
    %42 = arith.subf %41, %40 : vector<16x128xf32>
    %43 = math.exp %42 : vector<16x128xf32>
    %cst_22 = arith.constant 1.000000e+00 : f32
    %44 = vector.broadcast %cst_22 : f32 to vector<16x128xf32>
    %45 = arith.addf %44, %43 : vector<16x128xf32>
    %46 = tpu.reciprocal %45 : vector<16x128xf32> -> vector<16x128xf32>
    %c0_23 = arith.constant 0 : index
    %c0_24 = arith.constant 0 : index
    %47 = vector.load %arg7[%c0_23, %c0_24] : memref<16x128xf32, #tpu.memory_space<vmem>>, vector<16x128xf32>
    tpu.vector_store %arg7[%c0_23, %c0_24], %46 {strides = array<i32>} : memref<16x128xf32, #tpu.memory_space<vmem>>, vector<16x128xf32>,
    return
  }
}

</mosaic_0001>

<bundles_post_ra>
// kernel: tpu_custom_call.1
= control target key start
LH: loop header
LB: loop body
LE: loop exit
PB: predicated region body
PF: predicated region fallthrough
CT: control target
= control target key end

     0   :  { %12 = vsyncpa [#allocation3], 0  ;;  %s2235_s0 = inlined_call_operand.vmem [shape: s32[16,8], index: 0, kind: input, shape index: {}]   ;;  %s2236_s1 = inlined_call_operand.vmem [shape: s32[16,8], index: 1, kind: input, shape index: {}]   ;;  %s2237_s2 = inlined_call_operand.vmem [shape: s32[16,8], index: 2, kind: input, shape index: {}]   ;;  %s2238_s3 = inlined_call_operand.hbm [shape: f32[128,128], index: 3, kind: input, shape index: {}]   ;;  %s2239_s4 = inlined_call_operand.hbm [shape: f32[128,128], index: 4, kind: input, shape index: {}]   ;;  %s2240_s5 = inlined_call_operand.hbm [shape: f32[128,128], index: 5, kind: input, shape index: {}]   ;;  %s2241_s6 = inlined_call_operand.vmem [shape: f32[1,128], index: 6, kind: input, shape index: {}]   ;;  %s2242_s7 = inlined_call_operand.hbm [shape: f32[16,128], index: 7, kind: output, shape index: {}]  }
   0x1   :  { %13 = vsyncpa [#allocation6], 0 }
   0x2   :  { %14 = vsyncpa [#allocation4], 0  ;;  %s1726_s24 = smov [#allocation5]   ;;  %s1727_s26 = smov [#allocation2]  }
   0x3   :  { %s38_s25 = sshll.u32 %s1726_s24, 4  ;;  %s26_s27 = sshll.u32 %s1727_s26, 4  ;;  %s39_s25 = int_to_ptr.vmem [resolvable:$true] %s38_s25  ;;  %s1773_s27 = int_to_ptr.vmem [resolvable:$true] %s26_s27 }
   0x4   :  { %s1632_s30 = scalar_lea.hbm %s2239_s4, 2048 }
   0x5   :  { %p1633_p0 = scmp.ne.s32.totalorder %s2239_s4, %s1632_s30  ;;  %p1636_p1 = scmp.lt.u32.totalorder %s1632_s30, %s2239_s4 }
   0x7   :  { %p1638_p2 = pnand %p1636_p1, %p1633_p0 }
   0x9   :  { %1641 = shalt.err (!%p1638_p2)
}
   0xa   :  { %s1642_s12 = scalar_lea.vmem %s39_s25, 2048  ;;  %p1647_p4 = scmp.lt.s32.totalorder %s39_s25, %s39_s25 }
   0xb   :  { %p1643_p3 = scmp.ne.s32.totalorder %s39_s25, %s1642_s12  ;;  %p1648_p5 = scmp.lt.s32.totalorder %s1642_s12, %s1642_s12 }
   0xd   :  { %p1649_p6 = por %p1648_p5, %p1647_p4 }
   0xf   :  { %p1650_p7 = pnand %p1649_p6, %p1643_p3 }
  0x11   :  { %1653 = shalt.err (!%p1650_p7)
}
  0x12   :  { %s1728_s13 = smov 128   ;;  %s1729_s14 = smov 8  }
  0x13   :  { %44 = dma.hbm_to_vmem [thread:$0]  %s2239_s4, 2048, %s39_s25, [#allocation6], %s1728_s13, %s1728_s13, %s1729_s14  }
  0x14   :  { %s1654_s19 = scalar_lea.hbm %s2238_s3, 2048 }
  0x15   :  { %p1655_p8 = scmp.ne.s32.totalorder %s2238_s3, %s1654_s19  ;;  %p1658_p9 = scmp.lt.u32.totalorder %s1654_s19, %s2238_s3 }
  0x17   :  { %p1660_p10 = pnand %p1658_p9, %p1655_p8 }
  0x19   :  { %1663 = shalt.err (!%p1660_p10)
}
  0x1a   :  { %s1664_s24 = scalar_lea.vmem %s1773_s27, 2048  ;;  %p1669_p12 = scmp.lt.s32.totalorder %s1773_s27, %s1773_s27 }
  0x1b   :  { %p1665_p11 = scmp.ne.s32.totalorder %s1773_s27, %s1664_s24  ;;  %p1670_p13 = scmp.lt.s32.totalorder %s1664_s24, %s1664_s24 }
  0x1d   :  { %p1671_p0 = por %p1670_p13, %p1669_p12 }
  0x1f   :  { %p1672_p1 = pnand %p1671_p0, %p1665_p11 }
  0x21   :  { %1675 = shalt.err (!%p1672_p1)
}
  0x22   :  { %32 = dma.hbm_to_vmem [thread:$0]  %s2238_s3, 2048, %s1773_s27, [#allocation3], %s1728_s13, %s1728_s13, %s1729_s14  }
  0x23   :  { %s1730_s26 = smov [#allocation7]   ;;  %s1676_s8 = scalar_lea.hbm %s2240_s5, 2048 }
  0x24   :  { %s50_s28 = sshll.u32 %s1730_s26, 4  ;;  %p1677_p2 = scmp.ne.s32.totalorder %s2240_s5, %s1676_s8  ;;  %s51_s28 = int_to_ptr.vmem [resolvable:$true] %s50_s28 }
  0x25   :  { %p1680_p3 = scmp.lt.u32.totalorder %s1676_s8, %s2240_s5 }
  0x27   :  { %p1682_p4 = pnand %p1680_p3, %p1677_p2 }
  0x29   :  { %1685 = shalt.err (!%p1682_p4)
}
  0x2a   :  { %s1686_s15 = scalar_lea.vmem %s51_s28, 2048  ;;  %p1691_p6 = scmp.lt.s32.totalorder %s51_s28, %s51_s28 }
  0x2b   :  { %p1687_p5 = scmp.ne.s32.totalorder %s51_s28, %s1686_s15  ;;  %p1692_p7 = scmp.lt.s32.totalorder %s1686_s15, %s1686_s15 }
  0x2d   :  { %p1693_p8 = por %p1692_p7, %p1691_p6 }
  0x2f   :  { %p1694_p9 = pnand %p1693_p8, %p1687_p5 }
  0x31   :  { %1697 = shalt.err (!%p1694_p9)
}
  0x32   :  { %56 = dma.hbm_to_vmem [thread:$0]  %s2240_s5, 2048, %s51_s28, [#allocation6], %s1728_s13, %s1728_s13, %s1729_s14  }
  0x33   :  { %1720 = dma.done.wait [#allocation3], 2048  }
  0x34   :  { %1721 = vsyncadd [#allocation3], 4294965248 }
  0x35   :  { %1722 = dma.done.wait [#allocation6], 4096  }
  0x36   :  { %1723 = vsyncadd [#allocation6], 4294963200  ;;  %v70_v0 = vlaneseq  ;;  %v68_v5 = vld [vmem:[%s2235_s0] sm:$0xff]  ;;  %v1838_v6 = vld [vmem:[%s2235_s0 + $0x8] sm:$0xff]  ;;  %vm666_vm8 = vcmask 1041409   ;;  %vm668_vm12 = vcmask 1042434  }
  0x37   :  { %v344_v15 = vld [vmem:[#allocation2] sm:$0xff]  ;;  %v345_v19 = vld [vmem:[#allocation2 + $0x8] sm:$0xff]  ;;  %v346_v20 = vld [vmem:[#allocation2 + $0x10] sm:$0xff]  ;;  %s1732_s25 = smov [#allocation8]  }
  0x38   :  { %v73_v1 = vshrl.u32 %v70_v0, 7  ;;  %v347_v21 = vld [vmem:[#allocation2 + $0x18] sm:$0xff]  ;;  %v1549_v22 = vpack.c.bf16 %v345_v19, %v344_v15  ;;  %v348_v27 = vld [vmem:[#allocation2 + $0x20] sm:$0xff]  ;;  %v349_v28 = vld [vmem:[#allocation2 + $0x28] sm:$0xff] }
  0x39   :  { %v1553_v23 = vpack.c.bf16 %v347_v21, %v346_v20  ;;  %v1557_v29 = vpack.c.bf16 %v349_v28, %v348_v27  ;;  %v350_v33 = vld [vmem:[#allocation2 + $0x30] sm:$0xff]  ;;  %v351_v34 = vld [vmem:[#allocation2 + $0x38] sm:$0xff]  ;;  %v352_v38 = vld [vmem:[#allocation2 + $0x40] sm:$0xff] }
  0x3a   :  { %v1826_v2 = vsub.s32 2, %v73_v1  ;;  %v1828_v3 = vsub.s32 0, %v73_v1  ;;  %v1830_v4 = vsub.s32 1, %v73_v1  ;;  %v1845_v11 = vsub.s32 3, %v73_v1  ;;  %1550 = vmatprep.subr.bf16.mxu0 %v1549_v22  ;;  %v353_v39 = vld [vmem:[#allocation2 + $0x48] sm:$0xff]  ;;  %v354_v43 = vld [vmem:[#allocation2 + $0x50] sm:$0xff] }
  0x3b   :  { %v1850_v14 = vsub.s32 4, %v73_v1  ;;  %v1855_v18 = vsub.s32 5, %v73_v1  ;;  %v1860_v26 = vsub.s32 6, %v73_v1  ;;  %1552 = vmatpush3.bf16.msra.mxu0 %v1549_v22  ;;  %v1865_v32 = vsub.s32 7, %v73_v1  ;;  %v355_v44 = vld [vmem:[#allocation2 + $0x58] sm:$0xff]  ;;  %v1877_v45 = vld [vmem:[%s2236_s1] sm:$0xff] }
  0x3c   :  { %v89_v7 = vrot.slane %v68_v5, %v1826_v2  ;;  %v75_v8 = vrot.slane %v68_v5, %v1828_v3  ;;  %v131_v9 = vrot.slane %v1838_v6, %v1828_v3  ;;  %v82_v10 = vrot.slane %v68_v5, %v1830_v4  ;;  %1554 = vmatprep.subr.bf16.mxu0 %v1553_v23  ;;  %v1886_v49 = vld [vmem:[%s2237_s2] sm:$0xff]  ;;  %v356_v50 = vld [vmem:[#allocation2 + $0x60] sm:$0xff]  ;;  %v357_v51 = vld [vmem:[#allocation2 + $0x68] sm:$0xff] }
  0x3d   :  { %v96_v12 = vrot.slane %v68_v5, %v1845_v11  ;;  %v138_v13 = vrot.slane %v1838_v6, %v1830_v4  ;;  %v103_v16 = vrot.slane %v68_v5, %v1850_v14  ;;  %v145_v17 = vrot.slane %v1838_v6, %v1826_v2  ;;  %v1895_v55 = vld [vmem:[%s2236_s1 + $0x8] sm:$0xff]  ;;  %v635_v27 = vld [vmem:[#allocation5 + $0x8] sm:$0xff]  ;;  %v1145_v28 = vld [vmem:[#allocation7] sm:$0xff] }
  0x3e   :  { %91 = vbcast.lane.b32.xlu1 %v89_v7, 256  ;;  %77 = vbcast.lane.b32.xlu0 %v75_v8, 256  ;;  %v110_v24 = vrot.slane %v68_v5, %v1855_v18  ;;  %v152_v25 = vrot.slane %v1838_v6, %v1845_v11  ;;  %v117_v30 = vrot.slane %v68_v5, %v1860_v26  ;;  %v872_v60 = vld [vmem:[%s2237_s2 + $0x8] sm:$0xff] }
  0x3f   :  { %v159_v31 = vrot.slane %v1838_v6, %v1850_v14  ;;  %1556 = vmatpush3.bf16.msra.mxu0 %v1553_v23  ;;  %v1561_v35 = vpack.c.bf16 %v351_v34, %v350_v33  ;;  %v124_v36 = vrot.slane %v68_v5, %v1865_v32  ;;  %v166_v37 = vrot.slane %v1838_v6, %v1855_v18  ;;  %v358_v5 = vld [vmem:[#allocation2 + $0x70] sm:$0xff]  ;;  %v637_v33 = vld [vmem:[#allocation5 + $0x18] sm:$0xff] }
  0x40   :  { %1558 = vmatprep.subr.bf16.mxu0 %v1557_v29  ;;  %v1565_v40 = vpack.c.bf16 %v353_v39, %v352_v38  ;;  %v180_v41 = vrot.slane %v1838_v6, %v1865_v32  ;;  %v173_v42 = vrot.slane %v1838_v6, %v1860_v26  ;;  %v1569_v46 = vpack.c.bf16 %v355_v44, %v354_v43  ;;  %v359_v6 = vld [vmem:[#allocation2 + $0x78] sm:$0xff]  ;;  %v644_v43 = vld [vmem:[#allocation5 + $0x50] sm:$0xff] }
  0x41   :  { %v372_v47 = vrot.slane %v1877_v45, %v1830_v4  ;;  %v365_v48 = vrot.slane %v1877_v45, %v1828_v3  ;;  %v1573_v52 = vpack.c.bf16 %v357_v51, %v356_v50  ;;  %v883_v53 = vrot.slane %v1886_v49, %v1830_v4  ;;  %v641_v38 = vld [vmem:[#allocation5 + $0x38] sm:$0xff]  ;;  %v648_v50 = vld [vmem:[#allocation5 + $0x70] sm:$0xff] }
  0x42   :  { %133 = vbcast.lane.b32.xlu1 %v131_v9, 256  ;;  %84 = vbcast.lane.b32.xlu0 %v82_v10, 256  ;;  %v876_v54 = vrot.slane %v1886_v49, %v1828_v3  ;;  %v421_v56 = vrot.slane %v1895_v55, %v1828_v3  ;;  %v379_v57 = vrot.slane %v1877_v45, %v1826_v2  ;;  %v645_v44 = vld [vmem:[#allocation5 + $0x58] sm:$0xff] }
  0x43   :  { %1560 = vmatpush3.bf16.msra.mxu0 %v1557_v29  ;;  %v890_v58 = vrot.slane %v1886_v49, %v1826_v2  ;;  %v428_v59 = vrot.slane %v1895_v55, %v1830_v4  ;;  %v939_v61 = vrot.slane %v872_v60, %v1830_v4  ;;  %v932_v62 = vrot.slane %v872_v60, %v1828_v3  ;;  %v649_v51 = vld [vmem:[#allocation5 + $0x78] sm:$0xff] }
  0x44   :  { %1562 = vmatprep.subr.bf16.mxu0 %v1561_v35  ;;  %v435_v63 = vrot.slane %v1895_v55, %v1826_v2  ;;  %v386_v1 = vrot.slane %v1877_v45, %v1845_v11  ;;  %v1577_v7 = vpack.c.bf16 %v359_v6, %v358_v5  ;;  %v946_v8 = vrot.slane %v872_v60, %v1826_v2  ;;  %v1147_v5 = vld [vmem:[#allocation7 + $0x10] sm:$0xff]  ;;  %v1148_v6 = vld [vmem:[#allocation7 + $0x18] sm:$0xff] }
  0x45   :  { %v897_v4 = vrot.slane %v1886_v49, %v1845_v11  ;;  %v442_v3 = vrot.slane %v1895_v55, %v1845_v11  ;;  %v393_v9 = vrot.slane %v1877_v45, %v1850_v14  ;;  %v953_v10 = vrot.slane %v872_v60, %v1845_v11 }
  0x46   :  { %98 = vbcast.lane.b32.xlu1 %v96_v12, 256  ;;  %140 = vbcast.lane.b32.xlu0 %v138_v13, 256  ;;  %v904_v2 = vrot.slane %v1886_v49, %v1850_v14  ;;  %v449_v12 = vrot.slane %v1895_v55, %v1850_v14  ;;  %v400_v13 = vrot.slane %v1877_v45, %v1855_v18 }
  0x47   :  { %1564 = vmatpush3.bf16.msra.mxu0 %v1561_v35  ;;  %v960_v15 = vrot.slane %v872_v60, %v1850_v14  ;;  %v456_v11 = vrot.slane %v1895_v55, %v1855_v18  ;;  %v967_v19 = vrot.slane %v872_v60, %v1855_v18  ;;  %v918_v20 = vrot.slane %v1886_v49, %v1860_v26  ;;  %v638_v35 = vld [vmem:[#allocation5 + $0x20] sm:$0xff] }
  0x48   :  { %1566 = vmatprep.subr.bf16.mxu0 %v1565_v40  ;;  %v463_v14 = vrot.slane %v1895_v55, %v1860_v26  ;;  %v414_v21 = vrot.slane %v1877_v45, %v1865_v32  ;;  %v974_v22 = vrot.slane %v872_v60, %v1860_v26  ;;  %v925_v23 = vrot.slane %v1886_v49, %v1865_v32 }
  0x4a   :  { %105 = vbcast.lane.b32.xlu1 %v103_v16, 256  ;;  %147 = vbcast.lane.b32.xlu0 %v145_v17, 256  ;;  %v911_v16 = vrot.slane %v1886_v49, %v1855_v18  ;;  %v407_v17 = vrot.slane %v1877_v45, %v1860_v26  ;;  %v981_v18 = vrot.slane %v872_v60, %v1865_v32  ;;  %v636_v26 = vld [vmem:[#allocation5 + $0x10] sm:$0xff] }
  0x4b   :  { %1568 = vmatpush3.bf16.msra.mxu0 %v1565_v40  ;;  %v1521_v34 = vpack.c.bf16 %v637_v33, %v636_v26  ;;  %v642_v40 = vld [vmem:[#allocation5 + $0x40] sm:$0xff]  ;;  %v1537_v45 = vpack.c.bf16 %v645_v44, %v644_v43 }
  0x4c   :  { %1570 = vmatprep.subr.bf16.mxu0 %v1569_v46 }
  0x4e   :  { %112 = vbcast.lane.b32.xlu1 %v110_v24, 256  ;;  %154 = vbcast.lane.b32.xlu0 %v152_v25, 256  ;;  %v470_v24 = vrot.slane %v1895_v55, %v1865_v32  ;;  %v634_v25 = vld [vmem:[#allocation5] sm:$0xff]  ;;  %v639_v32 = vld [vmem:[#allocation5 + $0x28] sm:$0xff]  ;;  %v1731_v55 = vmov 0.0  }
  0x4f   :  { %1572 = vmatpush3.bf16.msra.mxu0 %v1569_v46  ;;  %v1517_v29 = vpack.c.bf16 %v635_v27, %v634_v25  ;;  %v646_v46 = vld [vmem:[#allocation5 + $0x60] sm:$0xff] }
  0x50   :  { %1574 = vmatprep.subr.bf16.mxu0 %v1573_v52 }
  0x51   :  { %1518 = vmatprep.subr.bf16.mxu1 %v1517_v29 }
  0x52   :  { %119 = vbcast.lane.b32.xlu1 %v117_v30, 256  ;;  %161 = vbcast.lane.b32.xlu0 %v159_v31, 256  ;;  %v1146_v30 = vld [vmem:[#allocation7 + $0x8] sm:$0xff] }
  0x53   :  { %1576 = vmatpush3.bf16.msra.mxu0 %v1573_v52  ;;  %v1948_v31 = vpack.c.bf16 %v1146_v30, %v1145_v28  ;;  %1520 = vmatpush3.bf16.msra.mxu1 %v1517_v29  ;;  %v1157_v29 = vld [vmem:[#allocation7 + $0x60] sm:$0xff] }
  0x54   :  { %1578 = vmatprep.subr.bf16.mxu0 %v1577_v7  ;;  %1522 = vmatprep.subr.bf16.mxu1 %v1521_v34 }
  0x56   :  { %126 = vbcast.lane.b32.xlu1 %v124_v36, 256  ;;  %168 = vbcast.lane.b32.xlu0 %v166_v37, 256  ;;  %v1525_v36 = vpack.c.bf16 %v639_v32, %v638_v35  ;;  %v640_v37 = vld [vmem:[#allocation5 + $0x30] sm:$0xff] }
  0x57   :  { %1580 = vmatpush3.bf16.msra.mxu0 %v1577_v7  ;;  %1524 = vmatpush3.bf16.msra.mxu1 %v1521_v34  ;;  %v1529_v39 = vpack.c.bf16 %v641_v38, %v640_v37  ;;  %v1159_v37 = vld [vmem:[#allocation7 + $0x70] sm:$0xff]  ;;  %v1160_v38 = vld [vmem:[#allocation7 + $0x78] sm:$0xff] }
  0x58   :  { %1582 = vmatprep.subr.bf16.mxu0 %v1948_v31  ;;  %1526 = vmatprep.subr.bf16.mxu1 %v1525_v36 }
  0x5a   :  { %182 = vbcast.lane.b32.xlu1 %v180_v41, 256  ;;  %175 = vbcast.lane.b32.xlu0 %v173_v42, 256  ;;  %v643_v41 = vld [vmem:[#allocation5 + $0x48] sm:$0xff] }
  0x5b   :  { %1528 = vmatpush3.bf16.msra.mxu1 %v1525_v36  ;;  %v1533_v42 = vpack.c.bf16 %v643_v41, %v642_v40  ;;  %v1158_v36 = vld [vmem:[#allocation7 + $0x68] sm:$0xff] }
  0x5c   :  { %1530 = vmatprep.subr.bf16.mxu1 %v1529_v39 }
  0x5e   :  { %374 = vbcast.lane.b32.xlu1 %v372_v47, 256  ;;  %367 = vbcast.lane.b32.xlu0 %v365_v48, 256  ;;  %v647_v47 = vld [vmem:[#allocation5 + $0x68] sm:$0xff]  ;;  %v1952_v48 = vand.u32 127, %v70_v0 }
  0x5f   :  { %1532 = vmatpush3.bf16.msra.mxu1 %v1529_v39  ;;  %v1541_v49 = vpack.c.bf16 %v647_v47, %v646_v46  ;;  %v1978_v47 = vpack.c.bf16 %v1158_v36, %v1157_v29 }
  0x60   :  { %1534 = vmatprep.subr.bf16.mxu1 %v1533_v42 }
  0x62   :  { %885 = vbcast.lane.b32.xlu1 %v883_v53, 256  ;;  %878 = vbcast.lane.b32.xlu0 %v876_v54, 256  ;;  %v1545_v54 = vpack.c.bf16 %v649_v51, %v648_v50 }
  0x63   :  { %1536 = vmatpush3.bf16.msra.mxu1 %v1533_v42 }
  0x64   :  { %1538 = vmatprep.subr.bf16.mxu1 %v1537_v45 }
  0x66   :  { %423 = vbcast.lane.b32.xlu1 %v421_v56, 256  ;;  %381 = vbcast.lane.b32.xlu0 %v379_v57, 256 }
  0x67   :  { %1540 = vmatpush3.bf16.msra.mxu1 %v1537_v45 }
  0x68   :  { %1542 = vmatprep.subr.bf16.mxu1 %v1541_v49 }
  0x6a   :  { %892 = vbcast.lane.b32.xlu1 %v890_v58, 256  ;;  %430 = vbcast.lane.b32.xlu0 %v428_v59, 256 }
  0x6b   :  { %1544 = vmatpush3.bf16.msra.mxu1 %v1541_v49  ;;  %v1980_v49 = vpack.c.bf16 %v1160_v38, %v1159_v37 }
  0x6c   :  { %1546 = vmatprep.subr.bf16.mxu1 %v1545_v54 }
  0x6e   :  { %941 = vbcast.lane.b32.xlu1 %v939_v61, 256  ;;  %934 = vbcast.lane.b32.xlu0 %v932_v62, 256 }
  0x6f   :  { %1548 = vmatpush3.bf16.msra.mxu1 %v1545_v54 }
  0x72   :  { %437 = vbcast.lane.b32.xlu1 %v435_v63, 256  ;;  %388 = vbcast.lane.b32.xlu0 %v386_v1, 256 }
  0x76   :  { %948 = vbcast.lane.b32.xlu1 %v946_v8, 256  ;;  %899 = vbcast.lane.b32.xlu0 %v897_v4, 256 }
  0x7a   :  { %444 = vbcast.lane.b32.xlu1 %v442_v3, 256  ;;  %395 = vbcast.lane.b32.xlu0 %v393_v9, 256  ;;  %v1149_v9 = vld [vmem:[#allocation7 + $0x20] sm:$0xff] }
  0x7e   :  { %955 = vbcast.lane.b32.xlu1 %v953_v10, 256  ;;  %906 = vbcast.lane.b32.xlu0 %v904_v2, 256  ;;  %v1150_v10 = vld [vmem:[#allocation7 + $0x28] sm:$0xff] }
  0x82   :  { %451 = vbcast.lane.b32.xlu1 %v449_v12, 256  ;;  %402 = vbcast.lane.b32.xlu0 %v400_v13, 256  ;;  %v1151_v13 = vld [vmem:[#allocation7 + $0x30] sm:$0xff] }
  0x86   :  { %962 = vbcast.lane.b32.xlu1 %v960_v15, 256  ;;  %913 = vbcast.lane.b32.xlu0 %v911_v16, 256 }
  0x8a   :  { %458 = vbcast.lane.b32.xlu1 %v456_v11, 256  ;;  %409 = vbcast.lane.b32.xlu0 %v407_v17, 256 }
  0x8e   :  { %969 = vbcast.lane.b32.xlu1 %v967_v19, 256  ;;  %920 = vbcast.lane.b32.xlu0 %v918_v20, 256  ;;  %v1152_v19 = vld [vmem:[#allocation7 + $0x38] sm:$0xff]  ;;  %v1153_v20 = vld [vmem:[#allocation7 + $0x40] sm:$0xff] }
  0x8f   :  { %v1970_v35 = vpack.c.bf16 %v1152_v19, %v1151_v13 }
  0x92   :  { %465 = vbcast.lane.b32.xlu1 %v463_v14, 256  ;;  %416 = vbcast.lane.b32.xlu0 %v414_v21, 256  ;;  %v1154_v14 = vld [vmem:[#allocation7 + $0x48] sm:$0xff]  ;;  %v1964_v21 = vpack.c.bf16 %v1148_v6, %v1147_v5 }
  0x93   :  { %v1972_v32 = vpack.c.bf16 %v1154_v14, %v1153_v20 }
  0x96   :  { %976 = vbcast.lane.b32.xlu1 %v974_v22, 256  ;;  %927 = vbcast.lane.b32.xlu0 %v925_v23, 256  ;;  %v1966_v22 = vpack.c.bf16 %v1150_v10, %v1149_v9  ;;  %v1155_v23 = vld [vmem:[#allocation7 + $0x50] sm:$0xff] }
  0x9a   :  { %983 = vbcast.lane.b32.xlu1 %v981_v18, 256  ;;  %472 = vbcast.lane.b32.xlu0 %v470_v24, 256  ;;  %v1156_v18 = vld [vmem:[#allocation7 + $0x58] sm:$0xff] }
  0x9b   :  { %v1974_v42 = vpack.c.bf16 %v1156_v18, %v1155_v23 }
  0xb0   :  { %v92_v52 = vpop.permute.xlu1 %91  ;;  %v78_v53 = vpop.permute.xlu0 %77 }
  0xb1   :  { %vm186_vm0 = vcmp.eq.s32.totalorder %v92_v52, %v1952_v48  ;;  %vm184_vm1 = vcmp.eq.s32.totalorder %v78_v53, %v1952_v48 }
  0xb2   :  { %v1311_v56 = vsel %vm186_vm0, 1.0, %v1731_v55  ;;  %v1309_v57 = vsel %vm184_vm1, 1.0, %v1731_v55 }
  0xb3   :  { %v244_v0 = vrot.slane %v1311_v56, 4  ;;  %v232_v58 = vrot.slane %v1309_v57, 4 }
  0xb4   :  { %v134_v59 = vpop.permute.xlu1 %133  ;;  %v85_v60 = vpop.permute.xlu0 %84 }
  0xb5   :  { %v245_v61 = vadd.f32 %v1311_v56, %v244_v0  ;;  %v233_v62 = vadd.f32 %v1309_v57, %v232_v58  ;;  %vm192_vm2 = vcmp.eq.s32.totalorder %v134_v59, %v1952_v48  ;;  %vm185_vm3 = vcmp.eq.s32.totalorder %v85_v60, %v1952_v48 }
  0xb6   :  { %v1317_v63 = vsel %vm192_vm2, 1.0, %v1731_v55  ;;  %v1310_v1 = vsel %vm185_vm3, 1.0, %v1731_v55 }
  0xb7   :  { %v246_v7 = vrot.slane %v245_v61, 2  ;;  %v234_v8 = vrot.slane %v233_v62, 2  ;;  %v280_v4 = vrot.slane %v1317_v63, 4  ;;  %v238_v3 = vrot.slane %v1310_v1, 4 }
  0xb8   :  { %v99_v2 = vpop.permute.xlu1 %98  ;;  %v141_v12 = vpop.permute.xlu0 %140 }
  0xb9   :  { %v247_v15 = vadd.f32 %v246_v7, %v245_v61  ;;  %v235_v16 = vadd.f32 %v234_v8, %v233_v62  ;;  %v281_v11 = vadd.f32 %v1317_v63, %v280_v4  ;;  %v239_v17 = vadd.f32 %v1310_v1, %v238_v3 }
  0xba   :  { %vm187_vm4 = vcmp.eq.s32.totalorder %v99_v2, %v1952_v48  ;;  %vm193_vm5 = vcmp.eq.s32.totalorder %v141_v12, %v1952_v48 }
  0xbb   :  { %v248_v24 = vrot.slane %v247_v15, 1  ;;  %v236_v25 = vrot.slane %v235_v16, 1  ;;  %v282_v27 = vrot.slane %v281_v11, 2  ;;  %v240_v28 = vrot.slane %v239_v17, 2 }
  0xbc   :  { %v1312_v30 = vsel %vm187_vm4, 1.0, %v1731_v55  ;;  %v1318_v26 = vsel %vm193_vm5, 1.0, %v1731_v55  ;;  %v106_v33 = vpop.permute.xlu1 %105  ;;  %v148_v34 = vpop.permute.xlu0 %147 }
  0xbd   :  { %v249_v39 = vadd.f32 %v248_v24, %v247_v15  ;;  %v283_v40 = vadd.f32 %v282_v27, %v281_v11  ;;  %v241_v41 = vadd.f32 %v240_v28, %v239_v17  ;;  %v250_v43 = vrot.slane %v1312_v30, 4 }
  0xbe   :  { %v286_v44 = vrot.slane %v1318_v26, 4  ;;  %vm188_vm6 = vcmp.eq.s32.totalorder %v106_v33, %v1952_v48  ;;  %vm194_vm7 = vcmp.eq.s32.totalorder %v148_v34, %v1952_v48  ;;  %v237_v45 = vadd.f32 %v236_v25, %v235_v16 }
  0xbf   :  { %v242_v46 = vrot.slane %v241_v41, 1  ;;  %v251_v50 = vadd.f32 %v1312_v30, %v250_v43  ;;  %v1313_v52 = vsel %vm188_vm6, 1.0, %v1731_v55  ;;  %v1319_v53 = vsel %vm194_vm7, 1.0, %v1731_v55 }
  0xc0   :  { %v287_v51 = vadd.f32 %v1318_v26, %v286_v44  ;;  %v113_v54 = vpop.permute.xlu1 %112  ;;  %v155_v56 = vpop.permute.xlu0 %154  ;;  %v1984_v57 = vmul.f32 0.125, %v249_v39  ;;  %v284_v0 = vrot.slane %v283_v40, 1  ;;  %v256_v58 = vrot.slane %v1313_v52, 4 }
  0xc1   :  { %v292_v59 = vrot.slane %v1319_v53, 4  ;;  %v252_v60 = vrot.slane %v251_v50, 2  ;;  %vm189_vm9 = vcmp.eq.s32.totalorder %v113_v54, %v1952_v48  ;;  %vm195_vm10 = vcmp.eq.s32.totalorder %v155_v56, %v1952_v48 }
  0xc2   :  { %v288_v61 = vrot.slane %v287_v51, 2  ;;  %v328_v62 = vmul.f32 0.125, %v237_v45  ;;  %v243_v63 = vadd.f32 %v242_v46, %v241_v41  ;;  %v257_v1 = vadd.f32 %v1313_v52, %v256_v58 }
  0xc3   :  { %v293_v5 = vadd.f32 %v1319_v53, %v292_v59  ;;  %v253_v6 = vadd.f32 %v252_v60, %v251_v50  ;;  %v1314_v8 = vsel %vm189_vm9, 1.0, %v1731_v55  ;;  %v1320_v4 = vsel %vm195_vm10, 1.0, %v1731_v55 }
  0xc4   :  { %v289_v7 = vadd.f32 %v288_v61, %v287_v51  ;;  %v120_v3 = vpop.permute.xlu1 %119  ;;  %v162_v9 = vpop.permute.xlu0 %161  ;;  %v285_v10 = vadd.f32 %v284_v0, %v283_v40  ;;  %v258_v2 = vrot.slane %v257_v1, 2  ;;  %v262_v13 = vrot.slane %v1314_v8, 4 }
  0xc5   :  { %v294_v12 = vrot.slane %v293_v5, 2  ;;  %v254_v15 = vrot.slane %v253_v6, 1  ;;  %v298_v11 = vrot.slane %v1320_v4, 4  ;;  %vm190_vm11 = vcmp.eq.s32.totalorder %v120_v3, %v1952_v48 }
  0xc6   :  { %v290_v16 = vrot.slane %v289_v7, 1  ;;  %v259_v17 = vadd.f32 %v258_v2, %v257_v1  ;;  %v263_v20 = vadd.f32 %v1314_v8, %v262_v13  ;;  %v1315_v14 = vsel %vm190_vm11, 1.0, %v1731_v55 }
  0xc7   :  { %v295_v19 = vadd.f32 %v294_v12, %v293_v5  ;;  %v329_v23 = vmul.f32 0.125, %v243_v63  ;;  %v299_v24 = vadd.f32 %v1320_v4, %v298_v11  ;;  %v268_v25 = vrot.slane %v1315_v14, 4 }
  0xc8   :  { %v291_v18 = vadd.f32 %v290_v16, %v289_v7  ;;  %v127_v27 = vpop.permute.xlu1 %126  ;;  %v169_v28 = vpop.permute.xlu0 %168  ;;  %v260_v29 = vrot.slane %v259_v17, 1  ;;  %v264_v26 = vrot.slane %v263_v20, 2  ;;  %vm196_vm13 = vcmp.eq.s32.totalorder %v162_v9, %v1952_v48 }
  0xc9   :  { %v296_v30 = vrot.slane %v295_v19, 1  ;;  %v336_v33 = vmul.f32 0.125, %v285_v10  ;;  %v255_v34 = vadd.f32 %v254_v15, %v253_v6  ;;  %v300_v36 = vrot.slane %v299_v24, 2 }
  0xca   :  { %v269_v37 = vadd.f32 %v1315_v14, %v268_v25  ;;  %v337_v38 = vmul.f32 0.125, %v291_v18  ;;  %v265_v40 = vadd.f32 %v264_v26, %v263_v20  ;;  %v1321_v41 = vsel %vm196_vm13, 1.0, %v1731_v55 }
  0xcb   :  { %v297_v39 = vadd.f32 %v296_v30, %v295_v19  ;;  %v261_v43 = vadd.f32 %v260_v29, %v259_v17  ;;  %v301_v44 = vadd.f32 %v300_v36, %v299_v24  ;;  %v304_v46 = vrot.slane %v1321_v41, 4 }
  0xcc   :  { %v270_v45 = vrot.slane %v269_v37, 2  ;;  %v183_v50 = vpop.permute.xlu1 %182  ;;  %v176_v51 = vpop.permute.xlu0 %175  ;;  %v1995_v52 = vsel %vm666_vm8, %v329_v23, %v328_v62  ;;  %v266_v54 = vrot.slane %v265_v40, 1  ;;  %vm191_vm14 = vcmp.eq.s32.totalorder %v127_v27, %v1952_v48 }
  0xcd   :  { %v338_v53 = vmul.f32 0.125, %v297_v39  ;;  %v302_v56 = vrot.slane %v301_v44, 1  ;;  %v305_v58 = vadd.f32 %v1321_v41, %v304_v46  ;;  %v1316_v59 = vsel %vm191_vm14, 1.0, %v1731_v55 }
  0xce   :  { %v271_v0 = vadd.f32 %v270_v45, %v269_v37  ;;  %v1999_v60 = vmul.f32 0.125, %v255_v34  ;;  %v787_v61 = vsel %vm666_vm8, %v337_v38, %v336_v33  ;;  %v274_v63 = vrot.slane %v1316_v59, 4 }
  0xcf   :  { %vm197_vm15 = vcmp.eq.s32.totalorder %v169_v28, %v1952_v48  ;;  %v2003_v1 = vmul.f32 0.125, %v261_v43  ;;  %v2006_v62 = vsel %vm668_vm12, %v338_v53, %v787_v61  ;;  %v306_v5 = vrot.slane %v305_v58, 2 }
  0xd0   :  { %v1322_v6 = vsel %vm197_vm15, 1.0, %v1731_v55  ;;  %v375_v7 = vpop.permute.xlu1 %374  ;;  %v368_v8 = vpop.permute.xlu0 %367  ;;  %v267_v4 = vadd.f32 %v266_v54, %v265_v40  ;;  %v275_v3 = vadd.f32 %v1316_v59, %v274_v63  ;;  %vm199_vm0 = vcmp.eq.s32.totalorder %v183_v50, %v1952_v48 }
  0xd1   :  { %v310_v9 = vrot.slane %v1322_v6, 4  ;;  %v303_v10 = vadd.f32 %v302_v56, %v301_v44  ;;  %v272_v2 = vrot.slane %v271_v0, 1  ;;  %v307_v12 = vadd.f32 %v306_v5, %v305_v58 }
  0xd2   :  { %v1324_v13 = vsel %vm199_vm0, 1.0, %v1731_v55  ;;  %v276_v15 = vrot.slane %v275_v3, 2  ;;  %vm198_vm1 = vcmp.eq.s32.totalorder %v176_v51, %v1952_v48  ;;  %vm475_vm2 = vcmp.eq.s32.totalorder %v375_v7, %v1952_v48 }
  0xd3   :  { %v311_v16 = vadd.f32 %v1322_v6, %v310_v9  ;;  %v322_v11 = vrot.slane %v1324_v13, 4  ;;  %v308_v17 = vrot.slane %v307_v12, 1  ;;  %v1323_v19 = vsel %vm198_vm1, 1.0, %v1731_v55 }
  0xd4   :  { %vm474_vm3 = vcmp.eq.s32.totalorder %v368_v8, %v1952_v48  ;;  %v886_v20 = vpop.permute.xlu1 %885  ;;  %v879_v14 = vpop.permute.xlu0 %878  ;;  %v2015_v23 = vmul.f32 0.125, %v267_v4  ;;  %v316_v25 = vrot.slane %v1323_v19, 4  ;;  %v2017_v27 = vmul.f32 0.125, %v303_v10 }
  0xd5   :  { %v312_v18 = vrot.slane %v311_v16, 2  ;;  %v323_v24 = vadd.f32 %v1324_v13, %v322_v11  ;;  %v1326_v28 = vsel %vm475_vm2, 1.0, %v1731_v55  ;;  %v1325_v29 = vsel %vm474_vm3, 1.0, %v1731_v55 }
  0xd6   :  { %vm986_vm4 = vcmp.eq.s32.totalorder %v886_v20, %v1952_v48  ;;  %v277_v30 = vadd.f32 %v276_v15, %v275_v3  ;;  %v317_v34 = vadd.f32 %v1323_v19, %v316_v25  ;;  %v309_v36 = vadd.f32 %v308_v17, %v307_v12 }
  0xd7   :  { %v313_v26 = vadd.f32 %v312_v18, %v311_v16  ;;  %v324_v33 = vrot.slane %v323_v24, 2  ;;  %v528_v37 = vrot.slane %v1326_v28, 4  ;;  %v522_v38 = vrot.slane %v1325_v29, 4 }
  0xd8   :  { %v1342_v39 = vsel %vm986_vm4, 1.0, %v1731_v55  ;;  %v424_v40 = vpop.permute.xlu1 %423  ;;  %v382_v41 = vpop.permute.xlu0 %381  ;;  %v318_v45 = vrot.slane %v317_v34, 2  ;;  %vm985_vm5 = vcmp.eq.s32.totalorder %v879_v14, %v1952_v48  ;;  %vm670_vm7 = vcmask 1043459  }
  0xd9   :  { %v314_v43 = vrot.slane %v313_v26, 1  ;;  %v325_v44 = vadd.f32 %v324_v33, %v323_v24  ;;  %v1039_v46 = vrot.slane %v1342_v39, 4  ;;  %v529_v50 = vadd.f32 %v1326_v28, %v528_v37 }
  0xda   :  { %v523_v51 = vadd.f32 %v1325_v29, %v522_v38  ;;  %vm482_vm6 = vcmp.eq.s32.totalorder %v424_v40, %v1952_v48  ;;  %v273_v53 = vadd.f32 %v272_v2, %v271_v0  ;;  %v278_v54 = vrot.slane %v277_v30, 1 }
  0xdb   :  { %v319_v56 = vadd.f32 %v318_v45, %v317_v34  ;;  %v1040_v58 = vadd.f32 %v1342_v39, %v1039_v46  ;;  %vm672_vm9 = vcmask 1044484   ;;  %v530_v59 = vrot.slane %v529_v50, 2 }
  0xdc   :  { %v524_v61 = vrot.slane %v523_v51, 2  ;;  %v1341_v63 = vsel %vm985_vm5, 1.0, %v1731_v55  ;;  %v1333_v5 = vsel %vm482_vm6, 1.0, %v1731_v55  ;;  %vm674_vm10 = vcmask 1045509   ;;  %v893_v6 = vpop.permute.xlu1 %892  ;;  %v431_v7 = vpop.permute.xlu0 %430 }
  0xdd   :  { %v2027_v8 = vmul.f32 0.125, %v309_v36  ;;  %v315_v4 = vadd.f32 %v314_v43, %v313_v26  ;;  %v326_v3 = vrot.slane %v325_v44, 1  ;;  %v1041_v9 = vrot.slane %v1040_v58, 2 }
  0xde   :  { %vm676_vm11 = vcmask 1046534   ;;  %v531_v0 = vadd.f32 %v530_v59, %v529_v50  ;;  %v525_v10 = vadd.f32 %v524_v61, %v523_v51  ;;  %v1033_v2 = vrot.slane %v1341_v63, 4 }
  0xdf   :  { %v570_v12 = vrot.slane %v1333_v5, 4  ;;  %vm678_vm13 = vcmask 1047559   ;;  %v320_v13 = vrot.slane %v319_v56, 1  ;;  %v1042_v15 = vadd.f32 %v1041_v9, %v1040_v58 }
  0xe0   :  { %vm476_vm14 = vcmp.eq.s32.totalorder %v382_v41, %v1952_v48  ;;  %v279_v16 = vadd.f32 %v278_v54, %v277_v30  ;;  %v532_v11 = vrot.slane %v531_v0, 1  ;;  %v526_v17 = vrot.slane %v525_v10, 1  ;;  %v942_v14 = vpop.permute.xlu1 %941  ;;  %v935_v18 = vpop.permute.xlu0 %934 }
  0xe1   :  { %v1034_v19 = vadd.f32 %v1341_v63, %v1033_v2  ;;  %v571_v20 = vadd.f32 %v1333_v5, %v570_v12  ;;  %v341_v24 = vmul.f32 0.125, %v315_v4  ;;  %v327_v25 = vadd.f32 %v326_v3, %v325_v44 }
  0xe2   :  { %v1043_v28 = vrot.slane %v1042_v15, 1  ;;  %v1327_v29 = vsel %vm476_vm14, 1.0, %v1731_v55  ;;  %v533_v26 = vadd.f32 %v532_v11, %v531_v0  ;;  %v527_v33 = vadd.f32 %v526_v17, %v525_v10 }
  0xe3   :  { %v1035_v34 = vrot.slane %v1034_v19, 2  ;;  %v572_v36 = vrot.slane %v571_v20, 2  ;;  %v321_v37 = vadd.f32 %v320_v13, %v319_v56  ;;  %v534_v39 = vrot.slane %v1327_v29, 4 }
  0xe4   :  { %v1044_v38 = vadd.f32 %v1043_v28, %v1042_v15  ;;  %v334_v40 = vmul.f32 0.125, %v273_v53  ;;  %v335_v43 = vmul.f32 0.125, %v279_v16  ;;  %v781_v45 = vsel %vm668_vm12, %v1984_v57, %v1995_v52  ;;  %v438_v46 = vpop.permute.xlu1 %437  ;;  %v2034_v44 = vpop.permute.xlu0 %388 }
  0xe5   :  { %v1036_v30 = vadd.f32 %v1035_v34, %v1034_v19  ;;  %v573_v41 = vadd.f32 %v572_v36, %v571_v20  ;;  %v619_v50 = vmul.f32 0.125, %v533_v26  ;;  %v535_v51 = vadd.f32 %v1327_v29, %v534_v39 }
  0xe6   :  { %v782_v54 = vsel %vm670_vm7, %v1999_v60, %v781_v45  ;;  %vm987_vm15 = vcmp.eq.s32.totalorder %v893_v6, %v1952_v48  ;;  %v618_v56 = vmul.f32 0.125, %v527_v33  ;;  %vm483_vm0 = vcmp.eq.s32.totalorder %v431_v7, %v1952_v48 }
  0xe7   :  { %v1037_v58 = vrot.slane %v1036_v30, 1  ;;  %v574_v53 = vrot.slane %v573_v41, 1  ;;  %v783_v59 = vsel %vm672_vm9, %v2003_v1, %v782_v54  ;;  %v536_v61 = vrot.slane %v535_v51, 2 }
  0xe8   :  { %v784_v57 = vsel %vm674_vm10, %v2015_v23, %v783_v59  ;;  %v1343_v52 = vsel %vm987_vm15, 1.0, %v1731_v55  ;;  %v342_v63 = vmul.f32 0.125, %v321_v37  ;;  %v949_v6 = vpop.permute.xlu1 %948  ;;  %v2046_v3 = vpop.permute.xlu0 %899  ;;  %v1130_v9 = vmul.f32 0.125, %v1044_v38 }
  0xe9   :  { %v1038_v5 = vadd.f32 %v1037_v58, %v1036_v30  ;;  %v785_v60 = vsel %vm676_vm11, %v334_v40, %v784_v57  ;;  %v1045_v4 = vrot.slane %v1343_v52, 4  ;;  %v575_v0 = vadd.f32 %v574_v53, %v573_v41 }
  0xea   :  { %v786_v1 = vsel %vm678_vm13, %v335_v43, %v785_v60  ;;  %v1334_v10 = vsel %vm483_vm0, 1.0, %v1731_v55  ;;  %v2051_v23 = vsel %vm666_vm8, %v619_v50, %v618_v56  ;;  %v537_v2 = vadd.f32 %v536_v61, %v535_v51 }
  0xeb   :  { %1479 = vmatprep.mubr.f32.mxu0 %v786_v1  ;;  %v1046_v7 = vadd.f32 %v1343_v52, %v1045_v4  ;;  %v576_v12 = vrot.slane %v1334_v10, 4  ;;  %v343_v13 = vmul.f32 0.125, %v327_v25  ;;  %v789_v15 = vsel %vm670_vm7, %v2017_v27, %v2006_v62 }
  0xec   :  { %vm994_vm1 = vcmp.eq.s32.totalorder %v942_v14, %v1952_v48  ;;  %vm993_vm2 = vcmp.eq.s32.totalorder %v935_v18, %v1952_v48  ;;  %v1129_v16 = vmul.f32 0.125, %v1038_v5  ;;  %v790_v19 = vsel %vm672_vm9, %v2027_v8, %v789_v15  ;;  %v2060_v20 = vpop.permute.xlu1 %444  ;;  %v2062_v28 = vpop.permute.xlu0 %395 }
  0xed   :  { %v1047_v11 = vrot.slane %v1046_v7, 2  ;;  %v577_v17 = vadd.f32 %v1334_v10, %v576_v12  ;;  %v2064_v29 = vmul.f32 0.125, %v575_v0  ;;  %v791_v25 = vsel %vm674_vm10, %v341_v24, %v790_v19 }
  0xee   :  { %v1350_v62 = vsel %vm994_vm1, 1.0, %v1731_v55  ;;  %v1349_v27 = vsel %vm993_vm2, 1.0, %v1731_v55  ;;  %v792_v26 = vsel %vm676_vm11, %v342_v63, %v791_v25  ;;  %v538_v34 = vrot.slane %v537_v2, 1 }
  0xef   :  { %v1048_v14 = vadd.f32 %v1047_v11, %v1046_v7  ;;  %v578_v18 = vrot.slane %v577_v17, 2  ;;  %v1087_v33 = vrot.slane %v1350_v62, 4  ;;  %v793_v8 = vsel %vm678_vm13, %v343_v13, %v792_v26 }
  0xf0   :  { %v1081_v36 = vrot.slane %v1349_v27, 4  ;;  %vm484_vm3 = vcmp.eq.s32.totalorder %v438_v46, %v1952_v48  ;;  %1480 = vmatmul.mubr.f32.vlgmr.msra.gmra.mrb[0].mxu0 %v793_v8  ;;  %v2073_v40 = vpop.permute.xlu1 %955  ;;  %v2075_v30 = vpop.permute.xlu0 %906  ;;  %vm477_vm4 = vcmp.eq.s32.totalorder %v2034_v44, %v1952_v48  ;;  %vm995_vm5 = vcmp.eq.s32.totalorder %v949_v6, %v1952_v48 }
  0xf1   :  { %v1049_v37 = vrot.slane %v1048_v14, 1  ;;  %v579_v38 = vadd.f32 %v578_v18, %v577_v17  ;;  %v1088_v39 = vadd.f32 %v1350_v62, %v1087_v33  ;;  %v1335_v24 = vsel %vm484_vm3, 1.0, %v1731_v55  ;;  %1584 = vmatpush3.bf16.msra.mxu0 %v1948_v31 }
  0xf2   :  { %v1082_v41 = vadd.f32 %v1349_v27, %v1081_v36  ;;  %v582_v43 = vrot.slane %v1335_v24, 4  ;;  %v1328_v51 = vsel %vm477_vm4, 1.0, %v1731_v55  ;;  %1586 = vmatprep.subr.bf16.mxu0 %v1964_v21  ;;  %v1351_v53 = vsel %vm995_vm5, 1.0, %v1731_v55 }
  0xf3   :  { %v1050_v45 = vadd.f32 %v1049_v37, %v1048_v14  ;;  %v580_v46 = vrot.slane %v579_v38, 1  ;;  %v1089_v50 = vrot.slane %v1088_v39, 2  ;;  %v540_v58 = vrot.slane %v1328_v51, 4 }
  0xf4   :  { %v1083_v54 = vrot.slane %v1082_v41, 2  ;;  %v583_v56 = vadd.f32 %v1335_v24, %v582_v43  ;;  %v1177_v59 = vsel %vm666_vm8, %v1130_v9, %v1129_v16  ;;  %v1093_v57 = vrot.slane %v1351_v53, 4  ;;  %v2085_v52 = vpop.permute.xlu1 %451  ;;  %v2090_v1 = vpop.permute.xlu0 %402 }
  0xf5   :  { %v581_v61 = vadd.f32 %v580_v46, %v579_v38  ;;  %v1090_v44 = vadd.f32 %v1089_v50, %v1088_v39  ;;  %v541_v5 = vadd.f32 %v1328_v51, %v540_v58  ;;  %vm988_vm6 = vcmp.eq.s32.totalorder %v2046_v3, %v1952_v48  ;;  %1588 = vmatpush3.bf16.msra.mxu0 %v1964_v21 }
  0xf6   :  { %v1084_v31 = vadd.f32 %v1083_v54, %v1082_v41  ;;  %v584_v63 = vrot.slane %v583_v56, 2  ;;  %v539_v60 = vadd.f32 %v538_v34, %v537_v2  ;;  %v1131_v4 = vmul.f32 0.125, %v1050_v45  ;;  %1590 = vmatprep.subr.bf16.mxu0 %v1966_v22 }
  0xf7   :  { %v1091_v6 = vrot.slane %v1090_v44, 1  ;;  %v1094_v0 = vadd.f32 %v1351_v53, %v1093_v57  ;;  %v542_v7 = vrot.slane %v541_v5, 2  ;;  %v1344_v12 = vsel %vm988_vm6, 1.0, %v1731_v55 }
  0xf8   :  { %v1085_v9 = vrot.slane %v1084_v31, 1  ;;  %v585_v10 = vadd.f32 %v584_v63, %v583_v56  ;;  %v627_v13 = vmul.f32 0.125, %v581_v61  ;;  %v1051_v11 = vrot.slane %v1344_v12, 4  ;;  %v2098_v27 = vpop.permute.xlu1 %962 }
  0xf9   :  { %v1092_v15 = vadd.f32 %v1091_v6, %v1090_v44  ;;  %v1095_v16 = vrot.slane %v1094_v0, 2  ;;  %v543_v21 = vadd.f32 %v542_v7, %v541_v5  ;;  %vm485_vm14 = vcmp.eq.s32.totalorder %v2060_v20, %v1952_v48  ;;  %1592 = vmatpush3.bf16.msra.mxu0 %v1966_v22  ;;  %v914_v22 = vpop.permute.xlu0 %913 }
  0xfa   :  { %v1086_v3 = vadd.f32 %v1085_v9, %v1084_v31  ;;  %v586_v17 = vrot.slane %v585_v10, 1  ;;  %v1052_v25 = vadd.f32 %v1344_v12, %v1051_v11  ;;  %v1336_v62 = vsel %vm485_vm14, 1.0, %v1731_v55  ;;  %1594 = vmatprep.subr.bf16.mxu0 %v1970_v35 }
  0xfb   :  { %v1138_v2 = vmul.f32 0.125, %v1092_v15  ;;  %v1096_v19 = vadd.f32 %v1095_v16, %v1094_v0  ;;  %v544_v26 = vrot.slane %v543_v21, 1  ;;  %v588_v33 = vrot.slane %v1336_v62, 4 }
  0xfc   :  { %v1137_v14 = vmul.f32 0.125, %v1086_v3  ;;  %v587_v18 = vadd.f32 %v586_v17, %v585_v10  ;;  %v1053_v8 = vrot.slane %v1052_v25, 2  ;;  %vm478_vm15 = vcmp.eq.s32.totalorder %v2062_v28, %v1952_v48 }
  0xfd   :  { %v1097_v34 = vrot.slane %v1096_v19, 1  ;;  %vm996_vm0 = vcmp.eq.s32.totalorder %v2073_v40, %v1952_v48  ;;  %v2105_v20 = vmul.f32 0.125, %v539_v60  ;;  %v2108_v36 = vsel %vm668_vm12, %v1131_v4, %v1177_v59  ;;  %1596 = vmatpush3.bf16.msra.mxu0 %v1970_v35  ;;  %v459_v35 = vpop.permute.xlu1 %458  ;;  %v2128_v57 = vpop.permute.xlu0 %409 }
  0xfe   :  { %v628_v37 = vmul.f32 0.125, %v587_v18  ;;  %v589_v38 = vadd.f32 %v1336_v62, %v588_v33  ;;  %v545_v39 = vadd.f32 %v544_v26, %v543_v21  ;;  %v1054_v24 = vadd.f32 %v1053_v8, %v1052_v25  ;;  %1598 = vmatprep.subr.bf16.mxu0 %v1972_v32 }
  0xff   :  { %v1329_v41 = vsel %vm478_vm15, 1.0, %v1731_v55  ;;  %v1352_v43 = vsel %vm996_vm0, 1.0, %v1731_v55  ;;  %v680_v28 = vsel %vm666_vm8, %v627_v13, %v2064_v29  ;;  %v1184_v40 = vsel %vm666_vm8, %v1138_v2, %v1137_v14 }
 0x100   :  { %v590_v45 = vrot.slane %v589_v38, 2  ;;  %v546_v46 = vrot.slane %v1329_v41, 4  ;;  %v1098_v50 = vadd.f32 %v1097_v34, %v1096_v19  ;;  %v1055_v51 = vrot.slane %v1054_v24, 1 }
 0x101   :  { %v1099_v54 = vrot.slane %v1352_v43, 4  ;;  %vm989_vm1 = vcmp.eq.s32.totalorder %v2075_v30, %v1952_v48  ;;  %vm486_vm2 = vcmp.eq.s32.totalorder %v2085_v52, %v1952_v48  ;;  %1600 = vmatpush3.bf16.msra.mxu0 %v1972_v32  ;;  %v2124_v29 = vsel %vm668_vm12, %v628_v37, %v680_v28  ;;  %v970_v13 = vpop.permute.xlu1 %969  ;;  %v921_v2 = vpop.permute.xlu0 %920 }
 0x102   :  { %v591_v56 = vadd.f32 %v590_v45, %v589_v38  ;;  %v547_v58 = vadd.f32 %v1329_v41, %v546_v46  ;;  %v1345_v53 = vsel %vm989_vm1, 1.0, %v1731_v55  ;;  %v2126_v59 = vmul.f32 0.125, %v545_v39  ;;  %1602 = vmatprep.subr.bf16.mxu0 %v1974_v42 }
 0x103   :  { %v1100_v61 = vadd.f32 %v1352_v43, %v1099_v54  ;;  %v1057_v44 = vrot.slane %v1345_v53, 4  ;;  %v1337_v63 = vsel %vm486_vm2, 1.0, %v1731_v55  ;;  %vm479_vm8 = vcmp.eq.s32.totalorder %v2090_v1, %v1952_v48 }
 0x104   :  { %v592_v30 = vrot.slane %v591_v56, 1  ;;  %v548_v31 = vrot.slane %v547_v58, 2  ;;  %v1139_v52 = vmul.f32 0.125, %v1098_v50  ;;  %v594_v60 = vrot.slane %v1337_v63, 4 }
 0x105   :  { %v1101_v32 = vrot.slane %v1100_v61, 2  ;;  %v1058_v5 = vadd.f32 %v1345_v53, %v1057_v44  ;;  %v1056_v4 = vadd.f32 %v1055_v51, %v1054_v24  ;;  %v1330_v0 = vsel %vm479_vm8, 1.0, %v1731_v55  ;;  %1604 = vmatpush3.bf16.msra.mxu0 %v1974_v42  ;;  %v466_v24 = vpop.permute.xlu1 %465  ;;  %v417_v50 = vpop.permute.xlu0 %416 }
 0x106   :  { %v549_v6 = vadd.f32 %v548_v31, %v547_v58  ;;  %vm997_vm3 = vcmp.eq.s32.totalorder %v2098_v27, %v1952_v48  ;;  %v595_v7 = vadd.f32 %v1337_v63, %v594_v60  ;;  %v552_v12 = vrot.slane %v1330_v0, 4  ;;  %1606 = vmatprep.subr.bf16.mxu0 %v1978_v47 }
 0x107   :  { %v1102_v9 = vadd.f32 %v1101_v32, %v1100_v61  ;;  %v1059_v10 = vrot.slane %v1058_v5, 2  ;;  %v593_v1 = vadd.f32 %v592_v30, %v591_v56  ;;  %v1353_v16 = vsel %vm997_vm3, 1.0, %v1731_v55 }
 0x108   :  { %v550_v15 = vrot.slane %v549_v6, 1  ;;  %vm990_vm4 = vcmp.eq.s32.totalorder %v914_v22, %v1952_v48  ;;  %v596_v17 = vrot.slane %v595_v7, 2  ;;  %v553_v21 = vadd.f32 %v1330_v0, %v552_v12 }
 0x109   :  { %v1103_v11 = vrot.slane %v1102_v9, 1  ;;  %v1060_v3 = vadd.f32 %v1059_v10, %v1058_v5  ;;  %v1105_v42 = vrot.slane %v1353_v16, 4  ;;  %v1346_v25 = vsel %vm990_vm4, 1.0, %v1731_v55  ;;  %1608 = vmatpush3.bf16.msra.mxu0 %v1978_v47  ;;  %v977_v32 = vpop.permute.xlu1 %976 }
 0x10a   :  { %v551_v19 = vadd.f32 %v550_v15, %v549_v6  ;;  %vm487_vm5 = vcmp.eq.s32.totalorder %v459_v35, %v1952_v48  ;;  %v597_v14 = vadd.f32 %v596_v17, %v595_v7  ;;  %v554_v18 = vrot.slane %v553_v21, 2  ;;  %1610 = vmatprep.subr.bf16.mxu0 %v1980_v49  ;;  %v928_v7 = vpop.permute.xlu0 %927 }
 0x10b   :  { %v1104_v62 = vadd.f32 %v1103_v11, %v1102_v9  ;;  %v1061_v27 = vrot.slane %v1060_v3, 1  ;;  %v1185_v26 = vsel %vm668_vm12, %v1139_v52, %v1184_v40  ;;  %v1106_v33 = vadd.f32 %v1353_v16, %v1105_v42 }
 0x10c   :  { %v1063_v34 = vrot.slane %v1346_v25, 4  ;;  %v1338_v8 = vsel %vm487_vm5, 1.0, %v1731_v55  ;;  %v2147_v22 = vmul.f32 0.125, %v1056_v4  ;;  %v598_v38 = vrot.slane %v597_v14, 1 }
 0x10d   :  { %v1140_v37 = vmul.f32 0.125, %v1104_v62  ;;  %v555_v39 = vadd.f32 %v554_v18, %v553_v21  ;;  %v1107_v41 = vrot.slane %v1106_v33, 2  ;;  %v600_v43 = vrot.slane %v1338_v8, 4  ;;  %1612 = vmatpush3.bf16.msra.mxu0 %v1980_v49 }
 0x10e   :  { %v1064_v47 = vadd.f32 %v1346_v25, %v1063_v34  ;;  %vm480_vm6 = vcmp.eq.s32.totalorder %v2128_v57, %v1952_v48  ;;  %v2152_v28 = vmul.f32 0.125, %v593_v1  ;;  %v2154_v40 = vmul.f32 0.125, %v551_v19 }
 0x10f   :  { %v1062_v45 = vadd.f32 %v1061_v27, %v1060_v3  ;;  %v556_v46 = vrot.slane %v555_v39, 1  ;;  %v1108_v51 = vadd.f32 %v1107_v41, %v1106_v33  ;;  %v601_v35 = vadd.f32 %v1338_v8, %v600_v43  ;;  %v984_v27 = vpop.permute.xlu1 %983 }
 0x110   :  { %v1065_v54 = vrot.slane %v1064_v47, 2  ;;  %v1331_v56 = vsel %vm480_vm6, 1.0, %v1731_v55  ;;  %v2158_v58 = vsel %vm670_vm7, %v1140_v37, %v1185_v26  ;;  %v599_v53 = vadd.f32 %v598_v38, %v597_v14  ;;  %v473_v38 = vpop.permute.xlu0 %472 }
 0x111   :  { %v558_v61 = vrot.slane %v1331_v56, 4  ;;  %vm998_vm14 = vcmp.eq.s32.totalorder %v970_v13, %v1952_v48  ;;  %v1109_v49 = vrot.slane %v1108_v51, 1  ;;  %v602_v57 = vrot.slane %v601_v35, 2 }
 0x112   :  { %v1066_v44 = vadd.f32 %v1065_v54, %v1064_v47  ;;  %v1354_v30 = vsel %vm998_vm14, 1.0, %v1731_v55  ;;  %v557_v31 = vadd.f32 %v556_v46, %v555_v39  ;;  %vm991_vm15 = vcmp.eq.s32.totalorder %v921_v2, %v1952_v48 }
 0x113   :  { %v559_v63 = vadd.f32 %v1331_v56, %v558_v61  ;;  %v1111_v52 = vrot.slane %v1354_v30, 4  ;;  %v1110_v5 = vadd.f32 %v1109_v49, %v1108_v51  ;;  %v603_v4 = vadd.f32 %v602_v57, %v601_v35 }
 0x114   :  { %v1067_v60 = vrot.slane %v1066_v44, 1  ;;  %v1347_v6 = vsel %vm991_vm15, 1.0, %v1731_v55  ;;  %vm488_vm0 = vcmp.eq.s32.totalorder %v466_v24, %v1952_v48  ;;  %v2165_v12 = vmul.f32 0.125, %v1062_v45 }
 0x115   :  { %v560_v0 = vrot.slane %v559_v63, 2  ;;  %v1112_v9 = vadd.f32 %v1354_v30, %v1111_v52  ;;  %v1069_v10 = vrot.slane %v1347_v6, 4  ;;  %v2167_v13 = vmul.f32 0.125, %v599_v53 }
 0x116   :  { %v604_v1 = vrot.slane %v603_v4, 1  ;;  %v1339_v15 = vsel %vm488_vm0, 1.0, %v1731_v55  ;;  %v2170_v21 = vmul.f32 0.125, %v557_v31  ;;  %v2172_v2 = vmul.f32 0.125, %v1110_v5 }
 0x117   :  { %v561_v16 = vadd.f32 %v560_v0, %v559_v63  ;;  %v1113_v11 = vrot.slane %v1112_v9, 2  ;;  %v1070_v3 = vadd.f32 %v1347_v6, %v1069_v10  ;;  %v606_v17 = vrot.slane %v1339_v15, 4 }
 0x118   :  { %vm481_vm1 = vcmp.eq.s32.totalorder %v417_v50, %v1952_v48  ;;  %vm999_vm2 = vcmp.eq.s32.totalorder %v977_v32, %v1952_v48  ;;  %v1068_v19 = vadd.f32 %v1067_v60, %v1066_v44  ;;  %v605_v14 = vadd.f32 %v604_v1, %v603_v4 }
 0x119   :  { %v1114_v42 = vadd.f32 %v1113_v11, %v1112_v9  ;;  %v1071_v25 = vrot.slane %v1070_v3, 2  ;;  %v607_v62 = vadd.f32 %v1339_v15, %v606_v17  ;;  %v1332_v18 = vsel %vm481_vm1, 1.0, %v1731_v55 }
 0x11a   :  { %v1355_v26 = vsel %vm999_vm2, 1.0, %v1731_v55  ;;  %vm992_vm8 = vcmp.eq.s32.totalorder %v928_v7, %v1952_v48  ;;  %v562_v33 = vrot.slane %v561_v16, 1  ;;  %v564_v39 = vrot.slane %v1332_v18, 4 }
 0x11b   :  { %v1115_v34 = vrot.slane %v1114_v42, 1  ;;  %v1072_v8 = vadd.f32 %v1071_v25, %v1070_v3  ;;  %v608_v37 = vrot.slane %v607_v62, 2  ;;  %v1117_v24 = vrot.slane %v1355_v26, 4 }
 0x11c   :  { %v1348_v41 = vsel %vm992_vm8, 1.0, %v1731_v55  ;;  %vm1000_vm3 = vcmp.eq.s32.totalorder %v984_v27, %v1952_v48  ;;  %v565_v50 = vadd.f32 %v1332_v18, %v564_v39  ;;  %vm489_vm4 = vcmp.eq.s32.totalorder %v473_v38, %v1952_v48 }
 0x11d   :  { %v1116_v47 = vadd.f32 %v1115_v34, %v1114_v42  ;;  %v1073_v43 = vrot.slane %v1072_v8, 1  ;;  %v609_v45 = vadd.f32 %v608_v37, %v607_v62  ;;  %v1075_v46 = vrot.slane %v1348_v41, 4 }
 0x11e   :  { %v1118_v51 = vadd.f32 %v1355_v26, %v1117_v24  ;;  %v1356_v54 = vsel %vm1000_vm3, 1.0, %v1731_v55  ;;  %v1134_v35 = vmul.f32 0.125, %v1068_v19  ;;  %v563_v56 = vadd.f32 %v562_v33, %v561_v16 }
 0x11f   :  { %v1074_v53 = vadd.f32 %v1073_v43, %v1072_v8  ;;  %v1076_v61 = vadd.f32 %v1348_v41, %v1075_v46  ;;  %v566_v49 = vrot.slane %v565_v50, 2  ;;  %v1123_v57 = vrot.slane %v1356_v54, 4 }
 0x120   :  { %v1119_v44 = vrot.slane %v1118_v51, 2  ;;  %v1340_v30 = vsel %vm489_vm4, 1.0, %v1731_v55  ;;  %v631_v31 = vmul.f32 0.125, %v605_v14  ;;  %v610_v63 = vrot.slane %v609_v45, 1 }
 0x121   :  { %v1077_v52 = vrot.slane %v1076_v61, 2  ;;  %v612_v32 = vrot.slane %v1340_v30, 4  ;;  %v1142_v5 = vmul.f32 0.125, %v1116_v47  ;;  %v567_v60 = vadd.f32 %v566_v49, %v565_v50 }
 0x122   :  { %v1120_v4 = vadd.f32 %v1119_v44, %v1118_v51  ;;  %v1124_v6 = vadd.f32 %v1356_v54, %v1123_v57  ;;  %v1135_v0 = vmul.f32 0.125, %v1074_v53  ;;  %v624_v10 = vmul.f32 0.125, %v563_v56 }
 0x123   :  { %v1078_v9 = vadd.f32 %v1077_v52, %v1076_v61  ;;  %v613_v48 = vadd.f32 %v1340_v30, %v612_v32  ;;  %v568_v7 = vrot.slane %v567_v60, 1  ;;  %v669_v16 = vsel %vm668_vm12, %v2105_v20, %v2051_v23 }
 0x124   :  { %v1121_v1 = vrot.slane %v1120_v4, 1  ;;  %v1125_v15 = vrot.slane %v1124_v6, 2  ;;  %v611_v55 = vadd.f32 %v610_v63, %v609_v45  ;;  %v671_v17 = vsel %vm670_vm7, %v2126_v59, %v669_v16 }
 0x125   :  { %v1079_v11 = vrot.slane %v1078_v9, 1  ;;  %v614_v3 = vrot.slane %v613_v48, 2  ;;  %v569_v25 = vadd.f32 %v568_v7, %v567_v60  ;;  %v673_v62 = vsel %vm672_vm9, %v2154_v40, %v671_v17 }
 0x126   :  { %v1122_v19 = vadd.f32 %v1121_v1, %v1120_v4  ;;  %v1126_v42 = vadd.f32 %v1125_v15, %v1124_v6  ;;  %v675_v18 = vsel %vm674_vm10, %v2170_v21, %v673_v62  ;;  %v1179_v23 = vsel %vm670_vm7, %v2147_v22, %v2108_v36 }
 0x127   :  { %v1080_v27 = vadd.f32 %v1079_v11, %v1078_v9  ;;  %v615_v14 = vadd.f32 %v614_v3, %v613_v48  ;;  %v625_v26 = vmul.f32 0.125, %v569_v25  ;;  %v677_v33 = vsel %vm676_vm11, %v624_v10, %v675_v18 }
 0x128   :  { %v1127_v20 = vrot.slane %v1126_v42, 1  ;;  %v1180_v59 = vsel %vm672_vm9, %v2165_v12, %v1179_v23  ;;  %v1143_v34 = vmul.f32 0.125, %v1122_v19  ;;  %v632_v38 = vmul.f32 0.125, %v611_v55 }
 0x129   :  { %v616_v8 = vrot.slane %v615_v14, 1  ;;  %v1136_v37 = vmul.f32 0.125, %v1080_v27  ;;  %v1181_v40 = vsel %vm674_vm10, %v1134_v35, %v1180_v59  ;;  %v679_v21 = vsel %vm678_vm13, %v625_v26, %v677_v33 }
 0x12a   :  { %v1128_v39 = vadd.f32 %v1127_v20, %v1126_v42  ;;  %v1182_v24 = vsel %vm676_vm11, %v1135_v0, %v1181_v40  ;;  %1444 = vmatprep.mubr.f32.mxu1 %v679_v21  ;;  %v682_v22 = vsel %vm670_vm7, %v2152_v28, %v2124_v29  ;;  %v1187_v12 = vsel %vm672_vm9, %v2172_v2, %v2158_v58 }
 0x12b   :  { %v617_v41 = vadd.f32 %v616_v8, %v615_v14  ;;  %v1183_v36 = vsel %vm678_vm13, %v1136_v37, %v1182_v24  ;;  %v683_v43 = vsel %vm672_vm9, %v2167_v13, %v682_v22  ;;  %v1188_v45 = vsel %vm674_vm10, %v1142_v5, %v1187_v12  ;;  %v1357_v13 = vld [vmem:[%s2241_s6] ss:$0 sm:$0xff]  ;;  %s1296_s6 = sshll.u32 %s1732_s25, 4  ;;  %s1297_s6 = int_to_ptr.vmem [resolvable:$true] %s1296_s6 }
 0x12c   :  { %v1144_v47 = vmul.f32 0.125, %v1128_v39  ;;  %1514 = vmatprep.mubr.f32.mxu0 %v1183_v36  ;;  %v684_v50 = vsel %vm674_vm10, %v631_v31, %v683_v43  ;;  %v1189_v51 = vsel %vm676_vm11, %v1143_v34, %v1188_v45  ;;  %s1698_s26 = scalar_lea.vmem %s1297_s6, 256  ;;  %p1703_p11 = scmp.lt.s32.totalorder %s1297_s6, %s1297_s6 }
 0x12d   :  { %v633_v46 = vmul.f32 0.125, %v617_v41  ;;  %v685_v54 = vsel %vm676_vm11, %v632_v38, %v684_v50  ;;  %p1699_p10 = scmp.ne.s32.totalorder %s1297_s6, %s1698_s26  ;;  %p1704_p12 = scmp.lt.s32.totalorder %s1698_s26, %s1698_s26 }
 0x12e   :  { %v1190_v29 = vsel %vm678_vm13, %v1144_v47, %v1189_v51 }
 0x12f   :  { %v686_v28 = vsel %vm678_vm13, %v633_v46, %v685_v54  ;;  %1515 = vmatmul.mubr.f32.vlgmr.msra.gmra.mrb[0].mxu0 %v1190_v29  ;;  %p1705_p13 = por %p1704_p12, %p1703_p11 }
 0x130   :  { %1445 = vmatmul.mubr.f32.vlgmr.msra.gmra.mrb[0].mxu1 %v686_v28 }
 0x131   :  { %p1706_p0 = pnand %p1705_p13, %p1699_p10 }
 0x202   :  { %v1516_v58 = vpop.f32.mrb[0].mxu0 }
 0x203   :  { %v1446_v2 = vpop.f32.mrb[0].mxu1  ;;  %v1259_v35 = vpop.f32.mrb[1].mxu0 }
 0x204   :  { %v1613_v56 = vadd.f32 %v1516_v58, %v1446_v2  ;;  %v755_v53 = vpop.f32.mrb[1].mxu1 }
 0x205   :  { %v1614_v61 = vadd.f32 %v1259_v35, %v755_v53 }
 0x206   :  { %v1278_v49 = vadd.f32 %v1613_v56, %v1357_v13 }
 0x207   :  { %v1277_v44 = vadd.f32 %v1614_v61, %v1357_v13 }
 0x208   :  { %v1280_v57 = vsub.f32 0.0, %v1278_v49 }
 0x209   :  { %v1279_v30 = vsub.f32 0.0, %v1277_v44 }
 0x20a   :  { %v1283_v31 = vmul.f32 1.442695, %v1280_v57 }
 0x20b   :  { %v1281_v63 = vmul.f32 1.442695, %v1279_v30 }
 0x20c   :  { %1624 = vpow2.f32 %v1283_v31 }
 0x20d   :  { %1626 = vpow2.f32 %v1281_v63 }
 0x216   :  { %v1625_v52 = vpop.eup %1624 }
 0x217   :  { %v1627_v32 = vpop.eup %1626  ;;  %v1286_v5 = vadd.f32 1.0, %v1625_v52 }
 0x218   :  { %v1285_v60 = vadd.f32 1.0, %v1627_v32 }
 0x219   :  { %1628 = vrcp.f32 %v1286_v5 }
 0x21a   :  { %1630 = vrcp.f32 %v1285_v60 }
 0x223   :  { %v1629_v4 = vpop.eup %1628 }
 0x224   :  { %v1631_v6 = vpop.eup %1630  ;;  %1290 = vst [vmem:[#allocation8 + $0x8] sm:$0xff] %v1629_v4 }
 0x225   :  { %1289 = vst [vmem:[#allocation8] sm:$0xff] %v1631_v6 }
 0x226   :  { %1709 = shalt.err (!%p1706_p0)
}
 0x227   :  { %s1710_s30 = scalar_lea.hbm %s2242_s7, 256 }
 0x228   :  { %p1711_p1 = scmp.ne.s32.totalorder %s2242_s7, %s1710_s30  ;;  %p1714_p2 = scmp.lt.u32.totalorder %s1710_s30, %s2242_s7 }
 0x22a   :  { %p1716_p3 = pnand %p1714_p2, %p1711_p1 }
 0x22c   :  { %1719 = shalt.err (!%p1716_p3)
}
 0x22d   :  { %1302 = dma.vmem_to_hbm [thread:$0]  %s1297_s6, 256, %s2242_s7, [#allocation4], %s1728_s13, %s1728_s13, %s1729_s14  }
 0x22e   :  { %1724 = dma.done.wait [#allocation4], 256  }
 0x22f   :  { %1725 = vsyncadd [#allocation4], 4294967040 }
 0x230   :  { %1306 = vsyncpa [#allocation3], 1 }
 0x231   :  { %1307 = vsyncpa [#allocation6], 1 }
 0x232   :  { %1308 = vsyncpa [#allocation4], 1 }

</bundles_post_ra>
